<compile_context>
chip_gen: v5e
topology: v5e:2x2
jax: 0.10.0
libtpu: 0.0.40
codegen_flags: <defaults>
</compile_context>

<pallas_src>
import jax
import jax.numpy as jnp
from jax.experimental import pallas as pl
from jax.experimental.pallas import tpu as pltpu


def _round_up(n: int, m: int) -> int:
    return ((n + m - 1) // m) * m


# ----------------------------- Pallas kernel -------------------------------

def forward_kernel(x_ref, w_ref, b_ref, o_ref):
    # z = x_tile @ W_eff_tile + b : [tm,K](->bf16) @ [K,tn]bf16 -> [tm,tn]f32
    x = x_ref[...].astype(w_ref.dtype)     # VPU cast, hidden under MXU/DMA slack
    z = jnp.dot(x, w_ref[...], preferred_element_type=jnp.float32)
    o_ref[...] = (z + b_ref[...]).astype(o_ref.dtype)


# ------------------------------ wrapper -------------------------------------

def grad_dict_forward(x, D, W_shortcut, b_shortcut, *, tile_m=None, rcond=1e-15):
    """x: [batch, input_size]; D: [input_size, n_components];
    W_shortcut: [latent, n_components] (PyTorch Linear layout); b: [latent]."""
    if x.ndim != 2:
        raise RuntimeError("x should be a 2d tensor")

    batch, input_size = x.shape
    latent = W_shortcut.shape[0]
    hi = jax.lax.Precision.HIGHEST

    # ---- XLA glue: project(), pinverse, tiny weight fold -------------------
    d32 = D.astype(jnp.float32)
    # Column-wise L2 normalization; like torch, an all-zero column yields nan.
    proj_D = d32 / jnp.sqrt(jnp.sum(d32 * d32, axis=0, keepdims=True))

    # TODO(synk): torch.pinverse (SVD pseudo-inverse) has no Pallas equivalent;
    # computed with jnp.linalg.pinv in the wrapper.  rcond=1e-15 matches
    # torch.pinverse's default cutoff (both scale by the largest singular value).
    pinv = jnp.linalg.pinv(proj_D.T, rcond)                   # [input, n_comp]

    # Fold the two matmuls in f32 (tiny, amortized over the batch).
    W_eff = jnp.dot(pinv, W_shortcut.T.astype(jnp.float32), precision=hi)

    # ---- hardware-aware budgets --------------------------------------------
    try:
        vmem_cap = int(pltpu.get_tpu_info().vmem_capacity_bytes)
    except Exception:
        vmem_cap = 64 * 1024 * 1024
    vmem_limit = min((vmem_cap * 3) // 4, 100 * 1024 * 1024)
    if tile_m is None:
        tile_m = 1024 if vmem_cap <= 64 * 1024 * 1024 else 2048

    x_itemsize = x.dtype.itemsize
    w_itemsize = 2                       # W_eff stored as bf16

    # ---- latent tiling: lane-dense, 256-aligned; resident W if it fits -----
    lat_p = _round_up(latent, 256)
    if input_size * lat_p * w_itemsize <= vmem_limit // 2:
        tn = lat_p                       # W_eff fully resident in VMEM
    else:
        # double-buffered (input_size, tn) weight tiles within half the budget
        max_tn = max(256, ((vmem_limit // 2) // (2 * input_size * w_itemsize))
                     // 256 * 256)
        tn = 256
        cand = 256
        while cand <= min(max_tn, lat_p):
            if lat_p % cand == 0:
                tn = cand
            cand += 256
    n_tiles = lat_p // tn
    resident = n_tiles == 1

    # ---- batch tiling: multiple of 8 that divides round_up(batch, 8) -------
    m8 = _round_up(batch, 8)
    q = m8 // 8
    w_vmem = input_size * tn * w_itemsize * (1 if resident else 2)
    row_bytes = 2 * input_size * x_itemsize + 2 * tn * x_itemsize  # x/out dbl-buf
    avail = max(vmem_limit - w_vmem - (1 << 20), row_bytes * 8)
    tm_vmem_cap = max(8, (avail // row_bytes) // 8 * 8)
    d_cap = max(1, min(q, tile_m // 8, tm_vmem_cap // 8))
    if q >= 2:
        d_cap = max(1, min(d_cap, q // 2))   # >=2 batch tiles -> v7x megacore
    d = 1
    for cand in range(d_cap, 0, -1):
        if q % cand == 0:
            d = cand
            break
    tm = 8 * d
    m_tiles = q // d

    # ---- operands (x padded by at most 7 rows; W_eff/bias zero-padded) -----
    x_p = x if m8 == batch else jnp.pad(x, ((0, m8 - batch), (0, 0)))
    W_eff_p = (jnp.zeros((input_size, lat_p), jnp.float32)
               .at[:, :latent].set(W_eff).astype(jnp.bfloat16))
    b_p = (jnp.zeros((1, lat_p), jnp.float32)
           .at[0, :latent].set(b_shortcut.astype(jnp.float32)))

    # Constant-index (resident) weight/bias blocks: single-buffer them.  When
    # the latent dim is tiled they are re-fetched, so keep default buffering.
    w_pipe = dict(pipeline_mode=pl.Buffered(1)) if resident else {}

    cost = pl.CostEstimate(
        flops=2 * m8 * input_size * lat_p,
        transcendentals=0,
        bytes_accessed=int(m8 * input_size * x_itemsize
                           + input_size * lat_p * w_itemsize
                           + lat_p * 4
                           + m8 * lat_p * x_itemsize),
    )

    out = pl.pallas_call(
        forward_kernel,
        out_shape=jax.ShapeDtypeStruct((m8, lat_p), x.dtype),
        grid_spec=pltpu.PrefetchScalarGridSpec(
            num_scalar_prefetch=0,
            grid=(n_tiles, m_tiles),         # batch innermost; W loaded once per j
            in_specs=[
                pl.BlockSpec((tm, input_size), lambda j, i: (i, 0)),      # x tile
                pl.BlockSpec((input_size, tn), lambda j, i: (0, j), **w_pipe),
                pl.BlockSpec((1, tn), lambda j, i: (0, j), **w_pipe),     # bias
            ],
            out_specs=pl.BlockSpec((tm, tn), lambda j, i: (i, j)),
        ),
        compiler_params=pltpu.CompilerParams(
            dimension_semantics=("parallel", "parallel"),
            vmem_limit_bytes=vmem_limit,
        ),
        cost_estimate=cost,
    )(x_p, W_eff_p, b_p)

    # Strip batch and lane padding.
    return out[:batch, :latent]


# ------------------------------- demo ---------------------------------------

if __name__ == "__main__":
    # Small, module-consistent shapes; batch=40 exercises the multi-step grid.
    batch = 40
    input_size = 32
    n_components = 16
    latent_space_size = 32

    key = jax.random.PRNGKey(0)
    k_d, k_w, k_b, k_x = jax.random.split(key, 4)

    D = 0.1 * jax.random.normal(k_d, (input_size, n_components), jnp.float32)
    W_shortcut = 0.1 * jax.random.normal(
        k_w, (latent_space_size, n_components), jnp.float32)  # nn.Linear (out, in)
    b_shortcut = 0.1 * jax.random.normal(k_b, (latent_space_size,), jnp.float32)

    x = jax.random.normal(k_x, (batch, input_size), jnp.float32)

    z = grad_dict_forward(x, D, W_shortcut, b_shortcut)
    z = jax.block_until_ready(z)
    assert z.shape == (batch, latent_space_size)

    # Pure-JAX f32 reference (un-reassociated).  The kernel matmul uses bf16
    # inputs with f32 accumulation, hence the relaxed tolerance.
    hi = jax.lax.Precision.HIGHEST
    proj_D_ref = D / jnp.linalg.norm(D, axis=0, keepdims=True)
    A_ref = jnp.dot(x, jnp.linalg.pinv(proj_D_ref.T), precision=hi)
    z_ref = jnp.dot(A_ref, W_shortcut.T, precision=hi) + b_shortcut
    assert jnp.allclose(z, z_ref, atol=3e-2, rtol=2e-2), "mismatch vs reference"

    print("KERNEL_OK")
</pallas_src>

<mosaic_0001>
module attributes {stable_mosaic.version = 11 : i64} {
  func.func @forward_kernel(%arg0: i32, %arg1: i32, %arg2: memref<8x32xf32, #tpu.memory_space<vmem>>, %arg3: memref<32x256xbf16, #tpu.memory_space<vmem>>, %arg4: memref<1x256xf32, #tpu.memory_space<vmem>>, %arg5: memref<8x256xf32, #tpu.memory_space<vmem>>) attributes {dimension_semantics = [#tpu.dimension_semantics<parallel>, #tpu.dimension_semantics<parallel>], iteration_bounds = array<i64: 1, 5>, scalar_prefetch = 0 : i64, scratch_operands = 0 : i64, tpu.core_type = #tpu.core_type<tc>, window_params = [{transform_indices = @transform_0, window_bounds = array<i64: 8, 32>}, {pipeline_mode = #tpu.pipeline_mode<synchronous>, transform_indices = @transform_1, window_bounds = array<i64: 32, 256>}, {pipeline_mode = #tpu.pipeline_mode<synchronous>, transform_indices = @transform_2, window_bounds = array<i64: 1, 256>}, {transform_indices = @transform_3, window_bounds = array<i64: 8, 256>}]} {
    %c0 = arith.constant 0 : index
    %c0_0 = arith.constant 0 : index
    %0 = vector.load %arg2[%c0, %c0_0] : memref<8x32xf32, #tpu.memory_space<vmem>>, vector<8x32xf32>
    %1 = arith.truncf %0 : vector<8x32xf32> to vector<8x32xbf16>
    %c0_1 = arith.constant 0 : index
    %c0_2 = arith.constant 0 : index
    %2 = vector.load %arg3[%c0_1, %c0_2] : memref<32x256xbf16, #tpu.memory_space<vmem>>, vector<32x256xbf16>
    %cst = arith.constant dense<0.000000e+00> : vector<8x256xf32>
    %3 = tpu.matmul %1, %2, %cst {dimension_numbers = #tpu.dot_dimension_numbers<[1], [0], [0], [1], [0, 0, 1, 1], [], []>} : vector<8x32xbf16>, vector<32x256xbf16>, vector<8x256xf32> -> vector<8x256xf32>
    %c0_3 = arith.constant 0 : index
    %c0_4 = arith.constant 0 : index
    %4 = vector.load %arg4[%c0_3, %c0_4] : memref<1x256xf32, #tpu.memory_space<vmem>>, vector<1x256xf32>
    %5 = vector.broadcast %4 : vector<1x256xf32> to vector<8x256xf32>
    %6 = arith.addf %3, %5 : vector<8x256xf32>
    %c0_5 = arith.constant 0 : index
    %c0_6 = arith.constant 0 : index
    %7 = vector.load %arg5[%c0_5, %c0_6] : memref<8x256xf32, #tpu.memory_space<vmem>>, vector<8x256xf32>
    tpu.vector_store %arg5[%c0_5, %c0_6], %6 {strides = array<i32>} : memref<8x256xf32, #tpu.memory_space<vmem>>, vector<8x256xf32>,
    return
  }
  func.func @transform_0(%arg0: i32, %arg1: i32) -> (i32, i32) {
    %c0_i32 = arith.constant 0 : i32
    %c0_i32_0 = arith.constant 0 : i32
    return %arg1, %c0_i32 : i32, i32
  }
  func.func @transform_1(%arg0: i32, %arg1: i32) -> (i32, i32) {
    %c0_i32 = arith.constant 0 : i32
    %c0_i32_0 = arith.constant 0 : i32
    return %c0_i32, %arg0 : i32, i32
  }
  func.func @transform_2(%arg0: i32, %arg1: i32) -> (i32, i32) {
    %c0_i32 = arith.constant 0 : i32
    %c0_i32_0 = arith.constant 0 : i32
    return %c0_i32, %arg0 : i32, i32
  }
  func.func @transform_3(%arg0: i32, %arg1: i32) -> (i32, i32) {
    %c0_i32 = arith.constant 0 : i32
    return %arg1, %arg0 : i32, i32
  }
}

</mosaic_0001>

<bundles_post_ra>
// kernel: tpu_custom_call.1
= control target key start
LH: loop header
LB: loop body
LE: loop exit
PB: predicated region body
PF: predicated region fallthrough
CT: control target
= control target key end

     0   :  { %8 = vsyncpa [#allocation3], 0  ;;  %s719_s0 = inlined_call_operand.vmem [shape: f32[40,32], index: 0, kind: input, shape index: {}]   ;;  %s720_s1 = inlined_call_operand.vmem [shape: bf16[32,256], index: 1, kind: input, shape index: {}]   ;;  %s721_s2 = inlined_call_operand.vmem [shape: f32[1,256], index: 2, kind: input, shape index: {}]   ;;  %s722_s3 = inlined_call_operand.hbm [shape: f32[40,256], index: 3, kind: output, shape index: {}]  }
   0x1   :  { %10 = vsyncpa [#allocation3 + $0x1], 0  ;;  %s595_s12 = smov 0   ;;  %s597_s13 = smov 0  }
   0x2   :  { %s599_s14 = smov 0   ;;  %s601_s15 = smov 0  }
   0x3   :  { %s603_s16 = smov 0   ;;  %s605_s17 = smov 0  }
   0x4 LB: > { %s403_s18 = sadd.s32 4294967295, %s573_s17   ;;  %s404_s19 = sadd.s32 4294967294, %s573_s17   ;;  %s573_s17 = sphi %s605_s17, %s16_s17   ;;  %s569_s16 = sphi %s603_s16, %s729_s16   ;;  %s565_s15 = sphi %s601_s15, %s728_s15   ;;  %s561_s14 = sphi %s599_s14, %s727_s14   ;;  %s557_s13 = sphi %s597_s13, %s726_s13   ;;  %s553_s12 = sphi %s595_s12, %s725_s12  }
   0x5   : > { %s25_s20 = sadd.s32 1, %s569_s16  ;;  %s115_s21 = sadd.s32 1, %s561_s14 }
   0x6   : > { %p26_p0 = scmp.ge.s32.totalorder %s25_s20, 5  ;;  %p125_p1 = scmp.ne.s32.totalorder %s561_s14, %s557_s13 }
   0x7   : > { %p126_p2 = scmp.eq.s32.totalorder %s403_s18, 4  ;;  %p131_p3 = scmp.ne.s32.totalorder %s557_s13, %s553_s12 }
   0x8   : > { %s731_s20 = smov (%p26_p0, %s25_s20), 0  ;;  %p132_p5 = scmp.eq.s32.totalorder %s404_s19, 4 }
   0x9   : > { %p635_p4 = por %p126_p2, %p125_p1  ;;  %s110_s23 = ssub.s32 %s569_s16, %s731_s20 }
   0xa   : > { %p409_p6 = scmp.ge.s32.totalorder %s573_s17, 1  ;;  %p113_p7 = scmp.eq.s32.totalorder %s110_s23, 0 }
   0xb   : > { %p642_p8 = por %p132_p5, %p131_p3  ;;  %p174_p9 = scmp.lt.s32.totalorder %s573_s17, 6 }
   0xc   : > { %s648_s25 = scalar_select %p113_p7, %s561_s14, %s115_s21  }
   0xd   : > { %p175_p10 = pnand %p409_p6, %p174_p9 }
   0xe   : > { %p206_p11 = scmp.lt.s32.totalorder (!%p175_p10), %s565_s15, 4  ;;  %s203_s30 = sand.u32 (!%p175_p10), 1, %s557_s13  }
   0xf   : > { %178 = sbr.rel (%p175_p10) target bundleno = 165 (0xa5), region = 32  ;;  %s439_s4 = sshll.u32 (!%p175_p10), %s565_s15, 4 }
  0x10   : > { %s410_s7 = sshll.u32 (!%p175_p10), %s203_s30, 4  ;;  %s301_s10 = scalar_lea.hbm (!%p175_p10), %s722_s3, %s439_s4 }
  0x11   : > { %s205_s11 = scalar_lea.vmem (!%p175_p10), [#allocation2], %s410_s7  ;;  %s305_s19 = sshll.u32 (!%p175_p10), %s301_s10, 4  ;;  %s306_s19 = int_to_ptr.hbm [resolvable:$true] %s305_s19 }
  0x12   : > { %s303_s18 = sshll.u32 (!%p175_p10), %s205_s11, 4  ;;  %s509_s21 = sshra.s32 (!%p175_p10), %s306_s19, 4  ;;  %s304_s18 = int_to_ptr.vmem [resolvable:$true] %s303_s18  ;;  %s510_s21 = int_to_ptr.hbm [resolvable:$true] %s509_s21 }
  0x13   : > { %s515_s28 = scalar_lea.hbm (!%p175_p10), %s722_s3, 80  ;;  %p516_p1 = scmp.lt.s32.totalorder (!%p175_p10), %s510_s21, %s722_s3 }
  0x14   : > { %v422_v0 = vld [vmem:[%s720_s1 + $0x10] sm:$0xf]  ;;  %v438_v1 = vld [vmem:[%s720_s1 + $0x14] sm:$0xf0]  ;;  %v437_v2 = vld [vmem:[%s720_s1 + $0x14] sm:$0xf] }
  0x15   : > { %v423_v3 = vor.u32 %v438_v1, %v422_v0  ;;  %v424_v4 = vld [vmem:[%s720_s1 + $0x18] sm:$0xf0]  ;;  %v414_v5 = vld [vmem:[%s720_s1] sm:$0xf]  ;;  %v436_v6 = vld [vmem:[%s720_s1 + $0x4] sm:$0xf0] }
  0x16   : > { %v427_v7 = vor.u32 %v437_v2, %v424_v4  ;;  %v435_v8 = vld [vmem:[%s720_s1 + $0x4] sm:$0xf]  ;;  %v416_v9 = vld [vmem:[%s720_s1 + $0x8] sm:$0xf0]  ;;  %v415_v10 = vor.u32 %v436_v6, %v414_v5  ;;  %s207_s23 = scalar_select %p206_p11, %s565_s15, 4  ;;  %vm255_vm0 = vcmask 261120  }
  0x17   : > { %265 = vmatpush.bf16.msra.mxu0 %v423_v3  ;;  %v419_v11 = vor.u32 %v435_v8, %v416_v9  ;;  %v229_v14 = vld [vmem:[%s721_s2] sm:$0x3]  ;;  %s288_s15 = scalar_lea.sflag [#allocation3], %s203_s30 }
  0x18   : > { %278 = vmatpush.bf16.msra.mxu1 %v427_v7  ;;  %s411_s26 = sshll.u32 %s207_s23, 3  ;;  %v231_v15 = vperm.slane %v229_v14, 0  ;;  %v232_v16 = vperm.slane %v229_v14, 1  ;;  %s511_s23 = scalar_lea.hbm %s510_s21, 16 }
  0x19   : > { %s209_s29 = scalar_lea.vmem %s719_s0, %s411_s26  ;;  %p512_p12 = scmp.ne.s32.totalorder %s510_s21, %s511_s23 }
  0x1a   : > { %v223_v12 = vld [vmem:[%s209_s29] sm:$0xff]  ;;  %p517_p2 = scmp.lt.s32.totalorder %s515_s28, %s511_s23 }
  0x1b   : > { %266 = vmatpush.bf16.msra.mxu0 %v415_v10  ;;  %v224_v13 = vpack.c.bf16 %v223_v12, %v223_v12  ;;  %p513_p13 = pnand %p512_p12, %p635_p4 }
  0x1c   : > { %279 = vmatpush.bf16.msra.mxu1 %v419_v11  ;;  %p518_p3 = por %p517_p2, %p516_p1 }
  0x1d   : > { %p514_p0 = pneg %p513_p13 }
  0x1e   : > { %428 = vmatmul.msk.bf16.vlgmr.msra.gmra.mxu0 %vm255_vm0, %v224_v13 }
  0x1f   : > { %429 = vmatmul.msk.bf16.vlgmr.msra.gmra.mxu1 %vm255_vm0, %v224_v13  ;;  %p519_p5 = pnand %p518_p3, %p514_p0 }
  0x9b   : > { %v268_v17 = vpop.f32.mrf.mxu0 }
  0x9c   : > { %v281_v18 = vpop.f32.mrf.mxu1  ;;  %v269_v19 = vadd.f32 %v268_v17, %v231_v15 }
  0x9d   : > { %v282_v20 = vadd.f32 %v281_v18, %v232_v16 }
  0x9e   : > { %285 = vst [vmem:[%s205_s11] sm:$0xff] %v269_v19 }
  0x9f   : > { %286 = vst [vmem:[%s205_s11 + $0x8] sm:$0xff] %v282_v20 }
  0xa0   : > { %522 = shalt.err (!%p519_p5)
}
  0xa1   : > { %440 = dma.vmem_to_hbm [thread:$0]  (%p635_p4), %s304_s18, 256, %s306_s19, %s288_s15  }
  0xa3   : > { %v270_v21 = vpop.f32.mrf.mxu0 }
  0xa4   : > { %v283_v22 = vpop.f32.mrf.mxu1 }
  0xa5 PF: > { %p446_p6 = scmp.ge.s32.totalorder %s573_s17, 2  ;;  %s317_s30 = sand.u32 1, %s553_s12  }
  0xa6   : > { %s318_s5 = scalar_lea.sflag [#allocation3], %s317_s30 }
  0xa7   : > { %p443_p7 = pnand %p446_p6, %p642_p8 }
  0xa9   : > { %p444_p9 = pneg %p443_p7 }
  0xab   : > { %548 = dma.done.wait (%p444_p9), %s318_s5, 256  }
  0xac   : > { %550 = vsyncadd (%p444_p9), %s318_s5, 4294967040  ;;  %s16_s17 = sadd.s32 1, %s573_s17   ;;  %s725_s12 = smov %s557_s13 }
  0xad   : > { %p13_p10 = scmp.ge.s32.totalorder %s16_s17, 7   ;;  %s726_s13 = smov %s561_s14 }
  0xae   : > { %s727_s14 = smov %s648_s25  ;;  %s728_s15 = smov %s569_s16 }
  0xaf   : > { %s729_s16 = smov %s731_s20  ;;  %15 = sbr.rel (!%p13_p10) target bundleno = 4 (0x4), region = 73 }
  0xb4   :  { %324 = vsyncpa [#allocation3], 1 }
  0xb5   :  { %326 = vsyncpa [#allocation3 + $0x1], 1 }

</bundles_post_ra>
